<compile_context>
chip_gen: v5e
topology: v5e:2x2
jax: 0.10.0
libtpu: 0.0.40
codegen_flags: <defaults>
</compile_context>

<pallas_src>
import jax
import jax.numpy as jnp
from jax import lax
from jax.experimental import pallas as pl
from jax.experimental.pallas import tpu as pltpu


def _round_up(x, m):
    return ((x + m - 1) // m) * m


# ---------------------------------------------------------------------------
# Kernel
# ---------------------------------------------------------------------------
def _randomnn_kernel(x_ref, w1t_ref, b1t_ref, w2t_ref, b2t_ref, w3t_ref, b3t_ref,
                     so_ref, out_ref):
    # Transposed layout: every activation is (features, tb) so batch sits on
    # the 128-wide lane axis and all vregs are lane-dense.
    x = x_ref[...].astype(w1t_ref.dtype)                       # (tb, n_in)

    # hidden1: h1[h, b] = sum_i W1[i, h] * x[b, i]  -> (n_hidden, tb)
    # Contract the LAST dims of both operands (flash-attention q @ k.T form);
    # avoids materializing x.T anywhere.
    h1 = lax.dot_general(w1t_ref[...], x, (((1,), (1,)), ((), ())),
                         preferred_element_type=jnp.float32)
    h1 = jnp.maximum(h1 + b1t_ref[...], 0.0)

    # hidden2 -> (n_hidden, tb)
    h2 = jnp.dot(w2t_ref[...], h1.astype(w2t_ref.dtype),
                 preferred_element_type=jnp.float32)
    h2 = jnp.maximum(h2 + b2t_ref[...], 0.0)

    # dropout (eval mode) == identity

    # output head -> (2, tb): row 0 = mean logits, row 1 = variance logits
    out = jnp.dot(w3t_ref[...], h2.astype(w3t_ref.dtype),
                  preferred_element_type=jnp.float32) + b3t_ref[...]

    # Fused epilogue: sigmoid(out) * [c0; c1] + [0; min_variance]
    out_ref[...] = (jax.nn.sigmoid(out) * so_ref[:, 0:1]
                    + so_ref[:, 1:2]).astype(out_ref.dtype)


# ---------------------------------------------------------------------------
# Tile / VMEM heuristics (padding-aware)
# ---------------------------------------------------------------------------
def _padded_vmem_bytes(tb, n_in, n_hidden, itemsize=4, x_buffers=3):
    """Per-step scoped-VMEM footprint including (8,128) layout padding."""
    lane = 128
    x_tile = tb * _round_up(n_in, lane) * itemsize          # pipelined x block
    x_val = tb * _round_up(n_in, lane) * 4                  # loaded value (f32)
    acts = 2 * _round_up(n_hidden, 8) * tb * 4               # h1, h2 (features on sublanes)
    out_tile = _round_up(2, 8) * tb * 4                      # (2, tb) block, sublane-padded
    weights = (_round_up(n_hidden, 8) * _round_up(n_in, lane)
               + _round_up(n_hidden, 8) * _round_up(n_hidden, lane)
               + _round_up(2, 8) * _round_up(n_hidden, lane)
               + 3 * 8 * lane) * itemsize
    return x_buffers * x_tile + x_val + acts + 3 * out_tile + 2 * weights


def _choose_tile(batch, n_in, n_hidden, itemsize=4):
    """Pick (tb, padded_batch). 1-TC parts (v5e/v6e, 128 MiB VMEM): fewest,
    biggest tiles.  2-TC / 64 MiB parts (v7x-like): even >=2 grid steps and a
    tighter padded-VMEM cap."""
    try:
        vmem_cap = int(pltpu.get_tpu_info().vmem_capacity_bytes)
    except Exception:
        vmem_cap = 64 * 1024 * 1024                          # conservative default
    small_vmem = vmem_cap <= 64 * 1024 * 1024                # v7x-like

    if batch < 128:                                          # single tiny tile
        bp = _round_up(batch, 8)
        return bp, bp

    budget = (20 if small_vmem else 32) * 1024 * 1024
    bp128 = _round_up(batch, 128)
    cands = [t for t in (8192, 4096, 2048, 1024, 512, 256, 128)
             if t <= bp128 and _padded_vmem_bytes(t, n_in, n_hidden, itemsize) <= budget]
    tb = cands[0] if cands else 128
    bp = _round_up(batch, tb)
    if small_vmem and tb >= 256:
        grid = bp // tb
        if grid == 1 or grid % 2 == 1:                       # keep both TCs busy
            tb //= 2
            bp = _round_up(batch, tb)
    return tb, bp


def _x_block_spec(tb, n_in, n_buffers):
    """x BlockSpec, optionally 3-deep pipelined (falls back if the running JAX
    version does not expose pipeline_mode/Buffered)."""
    if n_buffers > 2:
        try:
            return pl.BlockSpec((tb, n_in), lambda i: (i, 0),
                                pipeline_mode=pl.Buffered(n_buffers))
        except Exception:
            pass
    return pl.BlockSpec((tb, n_in), lambda i: (i, 0))


# ---------------------------------------------------------------------------
# Wrapper
# ---------------------------------------------------------------------------
def random_nn_forward(x, params, *, c=(1.0, 0.1), min_variance=1e-5,
                      tb=None, compute_dtype=None, vmem_limit_bytes=None):
    """x: (B, n_inputs) float32.  Returns (mean, variance), each (B,) float32."""
    w1, b1, w2, b2, w3, b3 = params
    B, n_in = x.shape
    n_hidden = w1.shape[1]
    itemsize = jnp.dtype(x.dtype).itemsize

    if compute_dtype is not None:
        # Narrow-precision MXU path: cast the tiny weights only; x stays in its
        # HBM dtype (cast happens per-tile in-kernel) -> no extra HBM pass.
        w1, w2, w3 = (a.astype(compute_dtype) for a in (w1, w2, w3))

    if tb is None:
        tb, Bp = _choose_tile(B, n_in, n_hidden, itemsize)
    else:
        Bp = _round_up(B, tb)
        assert tb % 128 == 0 or tb == Bp, \
            "tb must be a multiple of 128 (or cover the whole padded batch)"

    if Bp != B:
        x = jnp.pad(x, ((0, Bp - B), (0, 0)))    # tail rows sliced off below
    grid_steps = Bp // tb

    # Transposed ("batch-on-lanes") weights / biases -- tiny one-off transposes.
    w1t, w2t, w3t = w1.T, w2.T, w3.T                          # (nh,n_in),(nh,nh),(2,nh)
    b1t = jnp.reshape(b1, (-1, 1)).astype(jnp.float32)        # (nh, 1)
    b2t = jnp.reshape(b2, (-1, 1)).astype(jnp.float32)
    b3t = jnp.reshape(b3, (-1, 1)).astype(jnp.float32)        # (2, 1)

    # Per-row scale / offset: row 0 -> [c0, 0], row 1 -> [c1, min_variance]
    so = jnp.array([[c[0], 0.0], [c[1], min_variance]], dtype=jnp.float32)

    # Padding-corrected scoped-VMEM estimate; raise the limit only if needed.
    est = _padded_vmem_bytes(tb, n_in, n_hidden, itemsize,
                             x_buffers=3 if grid_steps >= 3 else 2)
    if vmem_limit_bytes is None and est > 12 * 1024 * 1024:
        vmem_limit_bytes = min(_round_up(int(est * 3 // 2), 1 << 20),
                               56 * 1024 * 1024)

    flops = 2 * Bp * (n_in * n_hidden + n_hidden * n_hidden + 2 * n_hidden)
    bytes_accessed = int(Bp * n_in * itemsize + Bp * 2 * 4
                         + (n_in * n_hidden + n_hidden * n_hidden
                            + 2 * n_hidden + 2 * n_hidden + 2 + 4) * 4)
    cost = pl.CostEstimate(flops=flops, transcendentals=2 * Bp,
                           bytes_accessed=bytes_accessed)

    const = lambda i: (0, 0)
    out = pl.pallas_call(
        _randomnn_kernel,
        out_shape=jax.ShapeDtypeStruct((2, Bp), jnp.float32),
        grid_spec=pltpu.PrefetchScalarGridSpec(
            num_scalar_prefetch=0,
            grid=(grid_steps,),
            in_specs=[
                _x_block_spec(tb, n_in, 3 if grid_steps >= 3 else 2),  # x tile
                pl.BlockSpec((n_hidden, n_in), const),       # W1^T (VMEM-resident)
                pl.BlockSpec((n_hidden, 1), const),          # b1
                pl.BlockSpec((n_hidden, n_hidden), const),   # W2^T
                pl.BlockSpec((n_hidden, 1), const),          # b2
                pl.BlockSpec((2, n_hidden), const),          # W3^T
                pl.BlockSpec((2, 1), const),                 # b3
                pl.BlockSpec((2, 2), const),                 # [scale | offset]
            ],
            out_specs=pl.BlockSpec((2, tb), lambda i: (0, i)),   # lane-dense output
        ),
        compiler_params=pltpu.CompilerParams(
            dimension_semantics=("parallel",),
            vmem_limit_bytes=vmem_limit_bytes),
        cost_estimate=cost,
    )(x, w1t, b1t, w2t, b2t, w3t, b3t, so)

    return out[0, :B], out[1, :B]


def init_params(key, n_inputs, n_hidden):
    """Deterministic init mimicking torch Linear default (uniform +-1/sqrt(fan_in))."""
    ks = jax.random.split(key, 6)

    def lin(kw, kb, fan_in, fan_out):
        bound = 1.0 / (fan_in ** 0.5)
        w = jax.random.uniform(kw, (fan_in, fan_out), jnp.float32, -bound, bound)
        b = jax.random.uniform(kb, (1, fan_out), jnp.float32, -bound, bound)
        return w, b

    w1, b1 = lin(ks[0], ks[1], n_inputs, n_hidden)
    w2, b2 = lin(ks[2], ks[3], n_hidden, n_hidden)
    w3, b3 = lin(ks[4], ks[5], n_hidden, 2)
    return (w1, b1, w2, b2, w3, b3)


if __name__ == "__main__":
    key = jax.random.PRNGKey(0)
    k_x, k_p = jax.random.split(key)

    batch, n_inputs, n_hidden = 256, 16, 32
    x = jax.random.normal(k_x, (batch, n_inputs), jnp.float32)
    params = init_params(k_p, n_inputs, n_hidden)

    # Plain-JAX reference (same math, no Pallas).
    w1, b1, w2, b2, w3, b3 = params
    h1 = jnp.maximum(x @ w1 + b1, 0.0)
    h2 = jnp.maximum(h1 @ w2 + b2, 0.0)
    out = h2 @ w3 + b3
    mean_ref = jax.nn.sigmoid(out[:, 0]) * 1.0
    var_ref = jax.nn.sigmoid(out[:, 1]) * 0.1 + 1e-5

    # 1) Auto-tiled path.
    mean, variance = random_nn_forward(x, params, c=(1.0, 0.1), min_variance=1e-5)
    jax.block_until_ready((mean, variance))
    assert mean.shape == (batch,) and variance.shape == (batch,)
    assert jnp.allclose(mean, mean_ref, atol=1e-5, rtol=1e-5)
    assert jnp.allclose(variance, var_ref, atol=1e-5, rtol=1e-5)

    # 2) Small-batch single-tile path (grid of 1, tb == padded batch).
    mean_s, var_s = random_nn_forward(x[:8], params)
    jax.block_until_ready((mean_s, var_s))
    assert jnp.allclose(mean_s, mean_ref[:8], atol=1e-5, rtol=1e-5)
    assert jnp.allclose(var_s, var_ref[:8], atol=1e-5, rtol=1e-5)

    # 3) Non-dividing batch: exercises the pad-up + tail-slice path.
    mean_p, var_p = random_nn_forward(x[:200], params)
    jax.block_until_ready((mean_p, var_p))
    assert mean_p.shape == (200,)
    assert jnp.allclose(mean_p, mean_ref[:200], atol=1e-5, rtol=1e-5)
    assert jnp.allclose(var_p, var_ref[:200], atol=1e-5, rtol=1e-5)

    # 4) Forced multi-step grid (grid=4): exercises the deeper x pipeline.
    x4 = jnp.concatenate([x, x], axis=0)
    mean4, var4 = random_nn_forward(x4, params, tb=128)
    jax.block_until_ready((mean4, var4))
    ref_m4 = jnp.concatenate([mean_ref, mean_ref])
    ref_v4 = jnp.concatenate([var_ref, var_ref])
    assert jnp.allclose(mean4, ref_m4, atol=1e-5, rtol=1e-5)
    assert jnp.allclose(var4, ref_v4, atol=1e-5, rtol=1e-5)

    print("KERNEL_OK")
</pallas_src>

<mosaic_0001>
module attributes {stable_mosaic.version = 11 : i64} {
  func.func @_randomnn_kernel(%arg0: i32, %arg1: memref<128x16xf32, #tpu.memory_space<vmem>>, %arg2: memref<32x16xf32, #tpu.memory_space<vmem>>, %arg3: memref<32x1xf32, #tpu.memory_space<vmem>>, %arg4: memref<32x32xf32, #tpu.memory_space<vmem>>, %arg5: memref<32x1xf32, #tpu.memory_space<vmem>>, %arg6: memref<2x32xf32, #tpu.memory_space<vmem>>, %arg7: memref<2x1xf32, #tpu.memory_space<vmem>>, %arg8: memref<2x2xf32, #tpu.memory_space<vmem>>, %arg9: memref<2x128xf32, #tpu.memory_space<vmem>>) attributes {dimension_semantics = [#tpu.dimension_semantics<parallel>], iteration_bounds = array<i64: 2>, scalar_prefetch = 0 : i64, scratch_operands = 0 : i64, tpu.core_type = #tpu.core_type<tc>, window_params = [{transform_indices = @transform_0, window_bounds = array<i64: 128, 16>}, {pipeline_mode = #tpu.pipeline_mode<synchronous>, transform_indices = @transform_1, window_bounds = array<i64: 32, 16>}, {pipeline_mode = #tpu.pipeline_mode<synchronous>, transform_indices = @transform_2, window_bounds = array<i64: 32, 1>}, {pipeline_mode = #tpu.pipeline_mode<synchronous>, transform_indices = @transform_3, window_bounds = array<i64: 32, 32>}, {pipeline_mode = #tpu.pipeline_mode<synchronous>, transform_indices = @transform_4, window_bounds = array<i64: 32, 1>}, {pipeline_mode = #tpu.pipeline_mode<synchronous>, transform_indices = @transform_5, window_bounds = array<i64: 2, 32>}, {pipeline_mode = #tpu.pipeline_mode<synchronous>, transform_indices = @transform_6, window_bounds = array<i64: 2, 1>}, {pipeline_mode = #tpu.pipeline_mode<synchronous>, transform_indices = @transform_7, window_bounds = array<i64: 2, 2>}, {transform_indices = @transform_8, window_bounds = array<i64: 2, 128>}]} {
    %c0 = arith.constant 0 : index
    %c0_0 = arith.constant 0 : index
    %0 = vector.load %arg1[%c0, %c0_0] : memref<128x16xf32, #tpu.memory_space<vmem>>, vector<128x16xf32>
    %c0_1 = arith.constant 0 : index
    %c0_2 = arith.constant 0 : index
    %1 = vector.load %arg2[%c0_1, %c0_2] : memref<32x16xf32, #tpu.memory_space<vmem>>, vector<32x16xf32>
    %cst = arith.constant dense<0.000000e+00> : vector<32x128xf32>
    %2 = tpu.matmul %1, %0, %cst {dimension_numbers = #tpu.dot_dimension_numbers<[1], [1], [0], [0], [0, 0, 1, 0], [], []>} : vector<32x16xf32>, vector<128x16xf32>, vector<32x128xf32> -> vector<32x128xf32>
    %c0_3 = arith.constant 0 : index
    %c0_4 = arith.constant 0 : index
    %3 = vector.load %arg3[%c0_3, %c0_4] : memref<32x1xf32, #tpu.memory_space<vmem>>, vector<32x1xf32>
    %4 = vector.broadcast %3 : vector<32x1xf32> to vector<32x128xf32>
    %5 = arith.addf %2, %4 : vector<32x128xf32>
    %cst_5 = arith.constant 0.000000e+00 : f32
    %6 = vector.broadcast %cst_5 : f32 to vector<32x128xf32>
    %7 = arith.maximumf %5, %6 : vector<32x128xf32>
    %c0_6 = arith.constant 0 : index
    %c0_7 = arith.constant 0 : index
    %8 = vector.load %arg4[%c0_6, %c0_7] : memref<32x32xf32, #tpu.memory_space<vmem>>, vector<32x32xf32>
    %cst_8 = arith.constant dense<0.000000e+00> : vector<32x128xf32>
    %9 = tpu.matmul %8, %7, %cst_8 {dimension_numbers = #tpu.dot_dimension_numbers<[1], [0], [0], [1], [0, 0, 1, 1], [], []>} : vector<32x32xf32>, vector<32x128xf32>, vector<32x128xf32> -> vector<32x128xf32>
    %c0_9 = arith.constant 0 : index
    %c0_10 = arith.constant 0 : index
    %10 = vector.load %arg5[%c0_9, %c0_10] : memref<32x1xf32, #tpu.memory_space<vmem>>, vector<32x1xf32>
    %11 = vector.broadcast %10 : vector<32x1xf32> to vector<32x128xf32>
    %12 = arith.addf %9, %11 : vector<32x128xf32>
    %cst_11 = arith.constant 0.000000e+00 : f32
    %13 = vector.broadcast %cst_11 : f32 to vector<32x128xf32>
    %14 = arith.maximumf %12, %13 : vector<32x128xf32>
    %c0_12 = arith.constant 0 : index
    %c0_13 = arith.constant 0 : index
    %15 = vector.load %arg6[%c0_12, %c0_13] : memref<2x32xf32, #tpu.memory_space<vmem>>, vector<2x32xf32>
    %cst_14 = arith.constant dense<0.000000e+00> : vector<2x128xf32>
    %16 = tpu.matmul %15, %14, %cst_14 {dimension_numbers = #tpu.dot_dimension_numbers<[1], [0], [0], [1], [0, 0, 1, 1], [], []>} : vector<2x32xf32>, vector<32x128xf32>, vector<2x128xf32> -> vector<2x128xf32>
    %c0_15 = arith.constant 0 : index
    %c0_16 = arith.constant 0 : index
    %17 = vector.load %arg7[%c0_15, %c0_16] : memref<2x1xf32, #tpu.memory_space<vmem>>, vector<2x1xf32>
    %18 = vector.broadcast %17 : vector<2x1xf32> to vector<2x128xf32>
    %19 = arith.addf %16, %18 : vector<2x128xf32>
    %20 = arith.negf %19 : vector<2x128xf32>
    %21 = math.exp %20 : vector<2x128xf32>
    %cst_17 = arith.constant 1.000000e+00 : f32
    %22 = vector.broadcast %cst_17 : f32 to vector<2x128xf32>
    %23 = arith.addf %22, %21 : vector<2x128xf32>
    %24 = arith.divf %22, %23 : vector<2x128xf32>
    %c0_18 = arith.constant 0 : index
    %c0_19 = arith.constant 0 : index
    %25 = vector.load %arg8[%c0_18, %c0_19] : memref<2x2xf32, #tpu.memory_space<vmem>>, vector<2x1xf32>
    %26 = vector.broadcast %25 : vector<2x1xf32> to vector<2x128xf32>
    %27 = arith.mulf %24, %26 : vector<2x128xf32>
    %c0_20 = arith.constant 0 : index
    %c1 = arith.constant 1 : index
    %28 = vector.load %arg8[%c0_20, %c1] : memref<2x2xf32, #tpu.memory_space<vmem>>, vector<2x1xf32>
    %29 = vector.broadcast %28 : vector<2x1xf32> to vector<2x128xf32>
    %30 = arith.addf %27, %29 : vector<2x128xf32>
    %c0_21 = arith.constant 0 : index
    %c0_22 = arith.constant 0 : index
    %31 = vector.load %arg9[%c0_21, %c0_22] : memref<2x128xf32, #tpu.memory_space<vmem>>, vector<2x128xf32>
    tpu.vector_store %arg9[%c0_21, %c0_22], %30 {strides = array<i32>} : memref<2x128xf32, #tpu.memory_space<vmem>>, vector<2x128xf32>,
    return
  }
  func.func @transform_0(%arg0: i32) -> (i32, i32) {
    %c0_i32 = arith.constant 0 : i32
    %c0_i32_0 = arith.constant 0 : i32
    return %arg0, %c0_i32 : i32, i32
  }
  func.func @transform_1(%arg0: i32) -> (i32, i32) {
    %c0_i32 = arith.constant 0 : i32
    %c0_i32_0 = arith.constant 0 : i32
    %c0_i32_1 = arith.constant 0 : i32
    return %c0_i32, %c0_i32_0 : i32, i32
  }
  func.func @transform_2(%arg0: i32) -> (i32, i32) {
    %c0_i32 = arith.constant 0 : i32
    %c0_i32_0 = arith.constant 0 : i32
    %c0_i32_1 = arith.constant 0 : i32
    return %c0_i32, %c0_i32_0 : i32, i32
  }
  func.func @transform_3(%arg0: i32) -> (i32, i32) {
    %c0_i32 = arith.constant 0 : i32
    %c0_i32_0 = arith.constant 0 : i32
    %c0_i32_1 = arith.constant 0 : i32
    return %c0_i32, %c0_i32_0 : i32, i32
  }
  func.func @transform_4(%arg0: i32) -> (i32, i32) {
    %c0_i32 = arith.constant 0 : i32
    %c0_i32_0 = arith.constant 0 : i32
    %c0_i32_1 = arith.constant 0 : i32
    return %c0_i32, %c0_i32_0 : i32, i32
  }
  func.func @transform_5(%arg0: i32) -> (i32, i32) {
    %c0_i32 = arith.constant 0 : i32
    %c0_i32_0 = arith.constant 0 : i32
    %c0_i32_1 = arith.constant 0 : i32
    return %c0_i32, %c0_i32_0 : i32, i32
  }
  func.func @transform_6(%arg0: i32) -> (i32, i32) {
    %c0_i32 = arith.constant 0 : i32
    %c0_i32_0 = arith.constant 0 : i32
    %c0_i32_1 = arith.constant 0 : i32
    return %c0_i32, %c0_i32_0 : i32, i32
  }
  func.func @transform_7(%arg0: i32) -> (i32, i32) {
    %c0_i32 = arith.constant 0 : i32
    %c0_i32_0 = arith.constant 0 : i32
    %c0_i32_1 = arith.constant 0 : i32
    return %c0_i32, %c0_i32_0 : i32, i32
  }
  func.func @transform_8(%arg0: i32) -> (i32, i32) {
    %c0_i32 = arith.constant 0 : i32
    %c0_i32_0 = arith.constant 0 : i32
    return %c0_i32, %arg0 : i32, i32
  }
}

</mosaic_0001>

<bundles_post_ra>
// kernel: tpu_custom_call.1
= control target key start
LH: loop header
LB: loop body
LE: loop exit
PB: predicated region body
PF: predicated region fallthrough
CT: control target
= control target key end

     0   :  { %13 = vsyncpa [#allocation3], 0  ;;  %s1069_s0 = inlined_call_operand.vmem [shape: f32[256,16], index: 0, kind: input, shape index: {}]   ;;  %s1070_s1 = inlined_call_operand.vmem [shape: f32[32,16], index: 1, kind: input, shape index: {}]   ;;  %s1071_s2 = inlined_call_operand.vmem [shape: f32[32,1], index: 2, kind: input, shape index: {}]   ;;  %s1072_s3 = inlined_call_operand.vmem [shape: f32[32,32], index: 3, kind: input, shape index: {}]   ;;  %s1073_s4 = inlined_call_operand.vmem [shape: f32[32,1], index: 4, kind: input, shape index: {}]   ;;  %s1074_s5 = inlined_call_operand.vmem [shape: f32[2,32], index: 5, kind: input, shape index: {}]   ;;  %s1075_s6 = inlined_call_operand.vmem [shape: f32[2,1], index: 6, kind: input, shape index: {}]   ;;  %s1076_s7 = inlined_call_operand.vmem [shape: f32[2,2], index: 7, kind: input, shape index: {}]   ;;  %s1077_s8 = inlined_call_operand.hbm [shape: f32[2,256], index: 8, kind: output, shape index: {}]  }
   0x1   :  { %15 = vsyncpa [#allocation3 + $0x1], 0  ;;  %s869_s27 = smov 0   ;;  %s871_s28 = smov 0  }
   0x2   :  { %s873_s29 = smov 0   ;;  %s875_s30 = smov 0  }
   0x3 LB: > { %s890_s9 = sadd.s32 4294967295, %s820_s30   ;;  %s655_s10 = sadd.s32 4294967294, %s820_s30   ;;  %s820_s30 = sphi %s875_s30, %s1083_s30   ;;  %s816_s29 = sphi %s873_s29, %s1082_s29   ;;  %s812_s28 = sphi %s871_s28, %s1081_s28   ;;  %s808_s27 = sphi %s869_s27, %s1080_s27  }
   0x4   : > { %s894_s11 = sadd.s32 1, %s820_s30   ;;  %s201_s12 = sadd.s32 1, %s816_s29 }
   0x5   : > { %s198_s13 = ssub.s32 %s820_s30, %s894_s11  ;;  %p211_p0 = scmp.ne.s32.totalorder %s816_s29, %s812_s28 }
   0x6   : > { %p199_p1 = scmp.eq.s32.totalorder %s198_s13, 0  ;;  %p212_p2 = scmp.eq.s32.totalorder %s890_s9, 1 }
   0x7   : > { %p217_p3 = scmp.ne.s32.totalorder %s812_s28, %s808_s27  ;;  %p218_p4 = scmp.eq.s32.totalorder %s655_s10, 1 }
   0x8   : > { %s905_s14 = scalar_select %p199_p1, %s816_s29, %s201_s12  }
   0x9   : > { %p907_p5 = por %p212_p2, %p211_p0  ;;  %p911_p6 = por %p218_p4, %p217_p3 }
   0xa   : > { %p658_p7 = scmp.ge.s32.totalorder %s820_s30, 1  ;;  %p266_p8 = scmp.lt.s32.totalorder %s820_s30, 3 }
   0xc   : > { %p267_p9 = pnand %p658_p7, %p266_p8 }
   0xd   : > { %s660_s17 = sshll.u32 (!%p267_p9), %s890_s9, 4  ;;  %s297_s22 = sand.u32 (!%p267_p9), 1, %s812_s28  }
   0xe   : > { %270 = sbr.rel (%p267_p9) target bundleno = 575 (0x23f), region = 52  ;;  %p301_p10 = scmp.lt.s32.totalorder (!%p267_p9), %s660_s17, 31 }
   0xf   : > { %s659_s23 = sshll.u32 (!%p267_p9), %s297_s22, 1  ;;  %s689_s24 = sshll.u32 (!%p267_p9), %s890_s9, 1 }
  0x10   : > { %s591_s10 = scalar_lea.hbm (!%p267_p9), %s1077_s8, %s689_s24  ;;  %s299_s12 = scalar_lea.vmem (!%p267_p9), [#allocation2], %s659_s23 }
  0x11   : > { %s595_s9 = sshll.u32 (!%p267_p9), %s591_s10, 4  ;;  %s581_s13 = scalar_lea.sflag (!%p267_p9), [#allocation3], %s297_s22  ;;  %s596_s9 = int_to_ptr.hbm [resolvable:$true] %s595_s9 }
  0x12   : > { %s778_s24 = scalar_lea.hbm (!%p267_p9), %s1077_s8, 4 }
  0x13   : > { %s1085_s17 = smov (!%p301_p10, %s660_s17), 31  ;;  %vm350_vm0 = vcmask 130048   ;;  %v329_v9 = vld [vmem:[%s1071_s2 + $0x18] sm:$0xff]  ;;  %v822_v11 = vmov 0   ;;  %v328_v13 = vld [vmem:[%s1071_s2 + $0x10] sm:$0xff]  ;;  %v327_v14 = vld [vmem:[%s1071_s2 + $0x8] sm:$0xff] }
  0x14   : > { %s661_s18 = sshll.u32 %s1085_s17, 3  ;;  %749 = vset.pattern.permute.xlu0 %v822_v11  ;;  %750 = vset.pattern.permute.xlu1 %v822_v11  ;;  %v449_v17 = vld [vmem:[%s1073_s4 + $0x8] sm:$0xff]  ;;  %v326_v18 = vld [vmem:[%s1071_s2] sm:$0xff]  ;;  %v324_v26 = vld [vmem:[%s1070_s1 + $0x10] sm:$0xff]  ;;  %vm472_vm1 = vcmask 261120   ;;  %v823_v52 = vmov 1  }
  0x15   : > { %s921_s21 = scalar_lea.vmem %s1069_s0, %s661_s18  ;;  %347 = vperm.xlu0 %749, %v329_v9   ;;  %751 = vset.pattern.permute.xlu2 %v822_v11  ;;  %v448_v21 = vld [vmem:[%s1073_s4] sm:$0xff]  ;;  %v323_v24 = vld [vmem:[%s1070_s1 + $0x8] sm:$0xff]  ;;  %v325_v27 = vld [vmem:[%s1070_s1 + $0x18] sm:$0xff]  ;;  %s772_s17 = sshra.s32 %s596_s9, 4  ;;  %s773_s17 = int_to_ptr.hbm [resolvable:$true] %s772_s17 }
  0x16   : > { %v321_v0 = vld [vmem:[%s921_s21 + $0x78] sm:$0xff]  ;;  %v320_v1 = vld [vmem:[%s921_s21 + $0x70] sm:$0xff]  ;;  %v319_v2 = vld [vmem:[%s921_s21 + $0x68] sm:$0xff]  ;;  %337 = vperm.xlu1 %750, %v327_v14   ;;  %s774_s18 = scalar_lea.hbm %s773_s17, 2  ;;  %p779_p0 = scmp.lt.s32.totalorder %s773_s17, %s1077_s8 }
  0x17   : > { %692 = vmatpush.xpose.msk.msra.mxu3 %vm350_vm0, %v321_v0  ;;  %662 = vmatpush.xpose.msk.msra.mxu0 %vm350_vm0, %v321_v0  ;;  %v318_v3 = vld [vmem:[%s921_s21 + $0x60] sm:$0xff]  ;;  %v317_v4 = vld [vmem:[%s921_s21 + $0x58] sm:$0xff]  ;;  %v316_v5 = vld [vmem:[%s921_s21 + $0x50] sm:$0xff]  ;;  %p775_p11 = scmp.ne.s32.totalorder %s773_s17, %s774_s18  ;;  %p780_p1 = scmp.lt.s32.totalorder %s778_s24, %s774_s18 }
  0x18   : > { %v315_v6 = vld [vmem:[%s921_s21 + $0x48] sm:$0xff]  ;;  %v314_v7 = vld [vmem:[%s921_s21 + $0x40] sm:$0xff]  ;;  %v313_v8 = vld [vmem:[%s921_s21 + $0x38] sm:$0xff] }
  0x19   : > { %v312_v10 = vld [vmem:[%s921_s21 + $0x30] sm:$0xff]  ;;  %v311_v12 = vld [vmem:[%s921_s21 + $0x28] sm:$0xff]  ;;  %v310_v15 = vld [vmem:[%s921_s21 + $0x20] sm:$0xff]  ;;  %p776_p12 = pnand %p775_p11, %p907_p5  ;;  %p781_p2 = por %p780_p1, %p779_p0 }
  0x1a   : > { %v309_v16 = vld [vmem:[%s921_s21 + $0x18] sm:$0xff]  ;;  %v308_v19 = vld [vmem:[%s921_s21 + $0x10] sm:$0xff]  ;;  %v307_v20 = vld [vmem:[%s921_s21 + $0x8] sm:$0xff] }
  0x1b   : > { %693 = vmatpush.xpose.msk.msra.mxu3 %vm350_vm0, %v320_v1  ;;  %663 = vmatpush.xpose.msk.msra.mxu0 %vm350_vm0, %v320_v1  ;;  %v567_v22 = vld [vmem:[%s1076_s7] sm:$0x3]  ;;  %v451_v40 = vld [vmem:[%s1073_s4 + $0x18] sm:$0xff]  ;;  %v450_v46 = vld [vmem:[%s1073_s4 + $0x10] sm:$0xff]  ;;  %p777_p13 = pneg %p776_p12 }
  0x1c   : > { %v306_v23 = vld [vmem:[%s921_s21] sm:$0xff]  ;;  %469 = vperm.xlu2 %751, %v451_v40   ;;  %v445_v47 = vld [vmem:[%s1072_s3 + $0x8] sm:$0xff]  ;;  %v446_v49 = vld [vmem:[%s1072_s3 + $0x10] sm:$0xff]  ;;  %s593_s21 = sshll.u32 %s299_s12, 4  ;;  %s594_s21 = int_to_ptr.vmem [resolvable:$true] %s593_s21 }
  0x1d   : > { %342 = vperm.xlu0 %749, %v328_v13   ;;  %v322_v25 = vld [vmem:[%s1070_s1] sm:$0xff]  ;;  %v447_v50 = vld [vmem:[%s1072_s3 + $0x18] sm:$0xff]  ;;  %p782_p3 = pnand %p781_p2, %p777_p13 }
  0x1e   : > { %332 = vperm.xlu1 %750, %v326_v18   ;;  %v444_v45 = vld [vmem:[%s1072_s3] sm:$0xff] }
  0x1f   : > { %694 = vmatpush.xpose.msk.msra.mxu3 %vm350_vm0, %v319_v2  ;;  %664 = vmatpush.xpose.msk.msra.mxu0 %vm350_vm0, %v319_v2  ;;  %v519_v48 = vld [vmem:[%s1075_s6] sm:$0x3] }
  0x23   : > { %695 = vmatpush.xpose.msk.msra.mxu3 %vm350_vm0, %v318_v3  ;;  %665 = vmatpush.xpose.msk.msra.mxu0 %vm350_vm0, %v318_v3 }
  0x24   : > { %464 = vperm.xlu2 %751, %v450_v46  }
  0x25   : > { %459 = vperm.xlu0 %749, %v449_v17  }
  0x26   : > { %454 = vperm.xlu1 %750, %v448_v21  }
  0x27   : > { %696 = vmatpush.xpose.msk.msra.mxu3 %vm350_vm0, %v317_v4  ;;  %666 = vmatpush.xpose.msk.msra.mxu0 %vm350_vm0, %v317_v4  ;;  %v518_v4 = vld [vmem:[%s1074_s5] sm:$0x3] }
  0x2b   : > { %697 = vmatpush.xpose.msk.msra.mxu3 %vm350_vm0, %v316_v5  ;;  %667 = vmatpush.xpose.msk.msra.mxu0 %vm350_vm0, %v316_v5 }
  0x2c   : > { %522 = vperm.xlu2 %751, %v519_v48  }
  0x2d   : > { %570 = vperm.xlu0 %749, %v567_v22  }
  0x2e   : > { %752 = vset.pattern.permute.xlu1 %v823_v52 }
  0x2f   : > { %698 = vmatpush.xpose.msk.msra.mxu3 %vm350_vm0, %v315_v6  ;;  %668 = vmatpush.xpose.msk.msra.mxu0 %vm350_vm0, %v315_v6 }
  0x30   : > { %575 = vperm.xlu1 %752, %v567_v22  }
  0x33   : > { %699 = vmatpush.xpose.msk.msra.mxu3 %vm350_vm0, %v314_v7  ;;  %669 = vmatpush.xpose.msk.msra.mxu0 %vm350_vm0, %v314_v7 }
  0x35   : > { %753 = vset.pattern.permute.xlu0 %v823_v52 }
  0x37   : > { %700 = vmatpush.xpose.msk.msra.mxu3 %vm350_vm0, %v313_v8  ;;  %670 = vmatpush.xpose.msk.msra.mxu0 %vm350_vm0, %v313_v8 }
  0x3b   : > { %701 = vmatpush.xpose.msk.msra.mxu3 %vm350_vm0, %v312_v10  ;;  %671 = vmatpush.xpose.msk.msra.mxu0 %vm350_vm0, %v312_v10 }
  0x3f   : > { %702 = vmatpush.xpose.msk.msra.mxu3 %vm350_vm0, %v311_v12  ;;  %672 = vmatpush.xpose.msk.msra.mxu0 %vm350_vm0, %v311_v12 }
  0x43   : > { %703 = vmatpush.xpose.msk.msra.mxu3 %vm350_vm0, %v310_v15  ;;  %673 = vmatpush.xpose.msk.msra.mxu0 %vm350_vm0, %v310_v15 }
  0x47   : > { %704 = vmatpush.xpose.msk.msra.mxu3 %vm350_vm0, %v309_v16  ;;  %674 = vmatpush.xpose.msk.msra.mxu0 %vm350_vm0, %v309_v16 }
  0x4b   : > { %705 = vmatpush.xpose.msk.msra.mxu3 %vm350_vm0, %v308_v19  ;;  %675 = vmatpush.xpose.msk.msra.mxu0 %vm350_vm0, %v308_v19 }
  0x4f   : > { %706 = vmatpush.xpose.msk.msra.mxu3 %vm350_vm0, %v307_v20  ;;  %676 = vmatpush.xpose.msk.msra.mxu0 %vm350_vm0, %v307_v20 }
  0x53   : > { %707 = vmatpush.xpose.msk.msra.mxu3 %vm350_vm0, %v306_v23  ;;  %677 = vmatpush.xpose.msk.msra.mxu0 %vm350_vm0, %v306_v23 }
  0x56   : > { %679 = vmatmul.msk.f32.vlgmr.msra.gmra.mxu3 %vm350_vm0, %v323_v24  ;;  %678 = vmatmul.msk.f32.vlgmr.msra.gmra.mxu0 %vm350_vm0, %v322_v25 }
  0x5e   : > { %680 = vmatmul.msk.f32.gmra.mxu3 %vm350_vm0, %v324_v26 }
  0x66   : > { %681 = vmatmul.msk.f32.gmra.mxu3 %vm350_vm0, %v325_v27 }
  0x76   : > { %v470_v54 = vpop.permute.xlu2 %469 }
  0x7e   : > { %v465_v56 = vpop.permute.xlu2 %464 }
  0x86   : > { %v523_v5 = vpop.permute.xlu2 %522 }
  0x87   : > { %v348_v29 = vpop.permute.xlu0 %347 }
  0x88   : > { %v338_v31 = vpop.permute.xlu1 %337 }
  0x8f   : > { %v343_v32 = vpop.permute.xlu0 %342 }
  0x90   : > { %v333_v39 = vpop.permute.xlu1 %332 }
  0x97   : > { %v460_v60 = vpop.permute.xlu0 %459 }
  0x98   : > { %v455_v63 = vpop.permute.xlu1 %454 }
  0x9f   : > { %v571_v20 = vpop.permute.xlu0 %570 }
  0xa2   : > { %v576_v21 = vpop.permute.xlu1 %575 }
  0xd3   : > { %v428_v36 = vpop.f32.mrf.mxu0 }
  0xd4   : > { %v429_v42 = vadd.f32 %v428_v36, %v333_v39 }
  0xd6   : > { %v440_v44 = vmax.f32 %v429_v42, 0.0 }
  0xd9   : > { %v431_v28 = vpop.f32.mrf.mxu3 }
  0xda   : > { %v432_v37 = vadd.f32 %v431_v28, %v338_v31 }
  0xdc   : > { %v441_v43 = vmax.f32 %v432_v37, 0.0 }
  0xe1   : > { %v434_v30 = vpop.f32.mrf.mxu3 }
  0xe2   : > { %v435_v34 = vadd.f32 %v434_v30, %v343_v32 }
  0xe4   : > { %v442_v41 = vmax.f32 %v435_v34, 0.0 }
  0xe9   : > { %v437_v33 = vpop.f32.mrf.mxu3 }
  0xea   : > { %v438_v35 = vadd.f32 %v437_v33, %v348_v29 }
  0xec   : > { %v443_v38 = vmax.f32 %v438_v35, 0.0 }
  0xee   : > { %497 = vmatpush.msra.mxu1 %v443_v38 }
  0xf0   : > { %498 = vmatpush.msra.mxu1 %v442_v41 }
  0xf2   : > { %499 = vmatpush.msra.mxu1 %v441_v43 }
  0xf4   : > { %500 = vmatpush.msra.mxu1 %v440_v44 }
  0xf5   : > { %682 = vmatmul.msk.f32.vlgmr.msra.gmra.mxu1 %vm472_vm1, %v444_v45 }
  0xfd   : > { %683 = vmatmul.msk.f32.gmra.mxu1 %vm472_vm1, %v445_v47 }
 0x105   : > { %684 = vmatmul.msk.f32.gmra.mxu1 %vm472_vm1, %v446_v49 }
 0x10d   : > { %685 = vmatmul.msk.f32.gmra.mxu1 %vm472_vm1, %v447_v50 }
 0x172   : > { %v502_v51 = vpop.f32.mrf.mxu1 }
 0x173   : > { %v503_v0 = vadd.f32 %v502_v51, %v455_v63 }
 0x175   : > { %v514_v3 = vmax.f32 %v503_v0, 0.0 }
 0x17a   : > { %v505_v53 = vpop.f32.mrf.mxu1 }
 0x17b   : > { %v506_v61 = vadd.f32 %v505_v53, %v460_v60 }
 0x17d   : > { %v515_v2 = vmax.f32 %v506_v61, 0.0 }
 0x182   : > { %v508_v55 = vpop.f32.mrf.mxu1 }
 0x183   : > { %v509_v58 = vadd.f32 %v508_v55, %v465_v56 }
 0x185   : > { %v516_v1 = vmax.f32 %v509_v58, 0.0 }
 0x18a   : > { %v511_v57 = vpop.f32.mrf.mxu1 }
 0x18b   : > { %v512_v59 = vadd.f32 %v511_v57, %v470_v54 }
 0x18d   : > { %v517_v62 = vmax.f32 %v512_v59, 0.0 }
 0x18f   : > { %540 = vmatpush.msra.mxu2 %v517_v62 }
 0x191   : > { %541 = vmatpush.msra.mxu2 %v516_v1 }
 0x193   : > { %542 = vmatpush.msra.mxu2 %v515_v2 }
 0x195   : > { %543 = vmatpush.msra.mxu2 %v514_v3 }
 0x196   : > { %686 = vmatmul.msk.f32.vlgmr.msra.gmra.mxu2 %vm472_vm1, %v518_v4 }
 0x219   : > { %v545_v6 = vpop.f32.mrf.mxu2 }
 0x21a   : > { %v546_v7 = vadd.f32 %v545_v6, %v523_v5 }
 0x21c   : > { %v687_v8 = vmul.f32 -1.442695, %v546_v7 }
 0x21e   : > { %754 = vpow2.f32 %v687_v8 }
 0x224   : > { %v755_v9 = vpop.eup %754 }
 0x225   : > { %v551_v10 = vadd.f32 1.0, %v755_v9 }
 0x227   : > { %756 = vrcp.f32 %v551_v10  ;;  %v563_v14 = vand.u32 2147483648, %v551_v10  ;;  %v561_v16 = vand.u32 2147483647, %v551_v10  ;;  %vm557_vm3 = vweird.f32 %v551_v10 }
 0x229   : > { %v564_v18 = vor.u32 1.1754944e-38, %v563_v14  ;;  %vm562_vm5 = vcmp.eq.f32.partialorder %v561_v16, 8.507059e+37 }
 0x22d   : > { %v757_v11 = vpop.eup %756 }
 0x22e   : > { %v553_v12 = vmul.f32 %v757_v11, %v551_v10  ;;  %vm558_vm2 = vweird.f32 %v757_v11 }
 0x22f   : > { %vm559_vm4 = vmor %vm557_vm3, %vm558_vm2 }
 0x230   : > { %v554_v13 = vsub.f32 1.0, %v553_v12 }
 0x232   : > { %v555_v15 = vmul.f32 %v757_v11, %v554_v13 }
 0x234   : > { %v556_v17 = vadd.f32 %v757_v11, %v555_v15 }
 0x236   : > { %v560_v19 = vsel %vm559_vm4, %v757_v11, %v556_v17 }
 0x237   : > { %v565_v22 = vsel %vm562_vm5, %v564_v18, %v560_v19 }
 0x238   : > { %v573_v23 = vmul.f32 %v571_v20, %v565_v22 }
 0x23a   : > { %v578_v24 = vadd.f32 %v576_v21, %v573_v23 }
 0x23c   : > { %579 = vst [vmem:[%s299_s12] sm:$0x3] %v578_v24 }
 0x23d   : > { %785 = shalt.err (!%p782_p3)
}
 0x23e   : > { %708 = dma.vmem_to_hbm [thread:$0]  (%p907_p5), %s594_s21, 32, %s596_s9, %s581_s13  }
 0x23f PF: > { %p714_p4 = scmp.ge.s32.totalorder %s820_s30, 2  ;;  %s607_s22 = sand.u32 1, %s808_s27  }
 0x240   : > { %s608_s26 = scalar_lea.sflag [#allocation3], %s607_s22 }
 0x241   : > { %p711_p7 = pnand %p714_p4, %p911_p6 }
 0x243   : > { %p712_p8 = pneg %p711_p7 }
 0x245   : > { %803 = dma.done.wait (%p712_p8), %s608_s26, 32  }
 0x246   : > { %805 = vsyncadd (%p712_p8), %s608_s26, 4294967264  ;;  %p18_p9 = scmp.ge.s32.totalorder %s894_s11, 4   ;;  %s1080_s27 = smov %s812_s28 }
 0x247   : > { %s1081_s28 = smov %s816_s29  ;;  %s1082_s29 = smov %s905_s14 }
 0x248   : > { %s1083_s30 = smov %s894_s11  ;;  %20 = sbr.rel (!%p18_p9) target bundleno = 3 (0x3), region = 87 }
 0x24d   :  { %614 = vsyncpa [#allocation3], 1 }
 0x24e   :  { %616 = vsyncpa [#allocation3 + $0x1], 1 }

</bundles_post_ra>
